<compile_context>
chip_gen: v7x
topology: tpu7x:2x2x1
jax: 0.10.0
libtpu: 0.0.40
codegen_flags: <defaults>
</compile_context>

<pallas_src>
import functools

import jax
import jax.numpy as jnp
from jax import lax
from jax.experimental import pallas as pl
from jax.experimental.pallas import tpu as pltpu


def _euclidean_loss_kernel(y_ref, d_ref, o_ref, acc_ref, *, cp2, ch2,
                           n_rows, n_cols):
    """Accumulates per-(sublane, lane) partial sums of w**2 for one row-block."""
    block_rows, block_cols = y_ref.shape
    acc_rows = acc_ref.shape[0]
    ri = pl.program_id(0)  # row-block index ("parallel")
    ci = pl.program_id(1)  # col-block index ("arbitrary" reduction axis)

    @pl.when(ci == 0)
    def _():
        acc_ref[...] = jnp.zeros_like(acc_ref)

    # Upcast (bf16 inputs supported) and compute the squared weighted residual.
    diff = y_ref[...].astype(jnp.float32) - d_ref[...].astype(jnp.float32)
    # w   = max(diff,0)*c_p + max(-diff,0)*c_h
    # w^2 = diff^2 * (c_p^2 if diff > 0 else c_h^2)   (exact: only one term is nonzero)
    wsq = (diff * diff) * jnp.where(diff > 0, jnp.float32(cp2), jnp.float32(ch2))

    # Mask ragged tail blocks (only emitted when the shape doesn't divide the block).
    need_row_mask = (n_rows % block_rows) != 0
    need_col_mask = (n_cols % block_cols) != 0
    if need_row_mask or need_col_mask:
        valid = None
        if need_row_mask:
            rows = ri * block_rows + lax.broadcasted_iota(
                jnp.int32, (block_rows, block_cols), 0)
            valid = rows < n_rows
        if need_col_mask:
            cols = ci * block_cols + lax.broadcasted_iota(
                jnp.int32, (block_rows, block_cols), 1)
            cmask = cols < n_cols
            valid = cmask if valid is None else (valid & cmask)
        wsq = jnp.where(valid, wsq, jnp.float32(0.0))

    # Sublane fold to the accumulator shape: VALU-only adds (no per-step
    # cross-lane XLU reduction, no serializing 1-element accumulator).
    partial = wsq[0:acc_rows, :]
    for g in range(1, block_rows // acc_rows):
        partial = partial + wsq[g * acc_rows:(g + 1) * acc_rows, :]
    acc_ref[...] += partial

    # Epilogue: emit this row-block's lane-dense partial sums.
    @pl.when(ci == pl.num_programs(1) - 1)
    def _():
        o_ref[...] = acc_ref[...]


_TARGET_BLOCK_ELEMS = 512 * 1024  # ~2 MiB of f32 per input block (safe on v5e/v6e/v7x)


def euclidean_loss(y, d, c_p, c_h):
    """sqrt(sum((max(y-d,0)*c_p + max(d-y,0)*c_h)**2)) — matches torch EuclideanLoss."""
    assert y.shape == d.shape and y.ndim == 2
    n_product, n_obs = y.shape

    # Column (lane) block: full width if small, else a multiple of 128 capped at 1024.
    if n_obs <= 128:
        block_cols = n_obs
    else:
        block_cols = min(1024, (n_obs // 128) * 128)

    # Row (sublane) block: multiple of 8, sized so one f32 input block is ~2 MiB.
    row_cap = max(8, (_TARGET_BLOCK_ELEMS // block_cols) // 8 * 8)
    if n_product <= 8:
        block_rows = n_product
    else:
        block_rows = min(row_cap, (n_product // 8) * 8)

    grid_r = pl.cdiv(n_product, block_rows)
    grid_c = pl.cdiv(n_obs, block_cols)
    acc_rows = min(8, block_rows)

    kernel = functools.partial(
        _euclidean_loss_kernel,
        cp2=float(c_p) * float(c_p),
        ch2=float(c_h) * float(c_h),
        n_rows=n_product,
        n_cols=n_obs,
    )

    partials = pl.pallas_call(
        kernel,
        out_shape=jax.ShapeDtypeStruct((grid_r * acc_rows, block_cols), jnp.float32),
        grid_spec=pltpu.PrefetchScalarGridSpec(
            num_scalar_prefetch=0,
            grid=(grid_r, grid_c),
            in_specs=[
                pl.BlockSpec((block_rows, block_cols), lambda ri, ci: (ri, ci)),
                pl.BlockSpec((block_rows, block_cols), lambda ri, ci: (ri, ci)),
            ],
            out_specs=pl.BlockSpec((acc_rows, block_cols), lambda ri, ci: (ri, 0)),
            scratch_shapes=[pltpu.VMEM((acc_rows, block_cols), jnp.float32)],
        ),
        compiler_params=pltpu.CompilerParams(
            # Row blocks are independent (megacore-shardable on v7x); the column
            # axis is the in-kernel reduction and stays sequential.
            dimension_semantics=("parallel", "arbitrary"),
        ),
    )(y, d)

    # Tiny final reduction (+ sqrt) over the per-block partial sums, in plain XLA.
    return jnp.sqrt(jnp.sum(partials))


def euclidean_loss_ref(y, d, c_p, c_h):
    y = y.astype(jnp.float32)
    d = d.astype(jnp.float32)
    diff = y - d
    w = jnp.maximum(diff, 0.0) * c_p + jnp.maximum(-diff, 0.0) * c_h
    return jnp.sqrt(jnp.sum(w * w))


if __name__ == "__main__":
    # Module "parameters" (constructor args), deterministic in-script.
    c_p = 2.0   # per-unit underage (stockout) cost
    c_h = 0.5   # per-unit overage (holding) cost

    key = jax.random.PRNGKey(0)
    k1, k2, k3, k4 = jax.random.split(key, 4)

    # Primary small case: (n_product, n_obs) = (16, 128).
    y = jax.random.normal(k1, (16, 128), dtype=jnp.float32)
    d = jax.random.normal(k2, (16, 128), dtype=jnp.float32)
    loss = jax.block_until_ready(euclidean_loss(y, d, c_p, c_h))
    ref = euclidean_loss_ref(y, d, c_p, c_h)
    assert jnp.allclose(loss, ref, rtol=1e-5, atol=1e-5), (loss, ref)

    # Ragged case: exercises the 2-D grid and row/col tail masking.
    y2 = jax.random.normal(k3, (44, 300), dtype=jnp.float32)
    d2 = jax.random.normal(k4, (44, 300), dtype=jnp.float32)
    loss2 = jax.block_until_ready(euclidean_loss(y2, d2, c_p, c_h))
    ref2 = euclidean_loss_ref(y2, d2, c_p, c_h)
    assert jnp.allclose(loss2, ref2, rtol=1e-5, atol=1e-5), (loss2, ref2)

    # bf16 inputs: halves HBM traffic; kernel upcasts and accumulates in f32.
    yb = y.astype(jnp.bfloat16)
    db = d.astype(jnp.bfloat16)
    loss3 = jax.block_until_ready(euclidean_loss(yb, db, c_p, c_h))
    ref3 = euclidean_loss_ref(yb, db, c_p, c_h)
    assert jnp.allclose(loss3, ref3, rtol=1e-4, atol=1e-4), (loss3, ref3)

    print("KERNEL_OK")
</pallas_src>

<mosaic_0001>
module attributes {stable_mosaic.version = 11 : i64} {
  func.func @_euclidean_loss_kernel(%arg0: i32, %arg1: i32, %arg2: memref<16x128xf32, #tpu.memory_space<vmem>>, %arg3: memref<16x128xf32, #tpu.memory_space<vmem>>, %arg4: memref<8x128xf32, #tpu.memory_space<vmem>>, %arg5: memref<8x128xf32, #tpu.memory_space<vmem>>) attributes {dimension_semantics = [#tpu.dimension_semantics<parallel>, #tpu.dimension_semantics<arbitrary>], iteration_bounds = array<i64: 1, 1>, scalar_prefetch = 0 : i64, scratch_operands = 1 : i64, tpu.core_type = #tpu.core_type<tc>, window_params = [{transform_indices = @transform_0, window_bounds = array<i64: 16, 128>}, {transform_indices = @transform_1, window_bounds = array<i64: 16, 128>}, {transform_indices = @transform_2, window_bounds = array<i64: 8, 128>}]} {
    %c0_i32 = arith.constant 0 : i32
    %0 = arith.cmpi eq, %arg1, %c0_i32 : i32
    %1 = arith.extui %0 : i1 to i32
    %c0_i32_0 = arith.constant 0 : i32
    %2 = arith.cmpi ne, %1, %c0_i32_0 : i32
    scf.if %2 {
      %cst_12 = arith.constant 0.000000e+00 : f32
      %22 = vector.broadcast %cst_12 : f32 to vector<8x128xf32>
      %c0_13 = arith.constant 0 : index
      %c0_14 = arith.constant 0 : index
      %23 = vector.load %arg5[%c0_13, %c0_14] : memref<8x128xf32, #tpu.memory_space<vmem>>, vector<8x128xf32>
      tpu.vector_store %arg5[%c0_13, %c0_14], %22 {strides = array<i32>} : memref<8x128xf32, #tpu.memory_space<vmem>>, vector<8x128xf32>,
    } else {
    }
    %c0 = arith.constant 0 : index
    %c0_1 = arith.constant 0 : index
    %3 = vector.load %arg2[%c0, %c0_1] : memref<16x128xf32, #tpu.memory_space<vmem>>, vector<16x128xf32>
    %c0_2 = arith.constant 0 : index
    %c0_3 = arith.constant 0 : index
    %4 = vector.load %arg3[%c0_2, %c0_3] : memref<16x128xf32, #tpu.memory_space<vmem>>, vector<16x128xf32>
    %5 = arith.subf %3, %4 : vector<16x128xf32>
    %6 = arith.mulf %5, %5 : vector<16x128xf32>
    %cst = arith.constant 0.000000e+00 : f32
    %7 = vector.broadcast %cst : f32 to vector<16x128xf32>
    %8 = arith.cmpf ogt, %5, %7 : vector<16x128xf32>
    %cst_4 = arith.constant 4.000000e+00 : f32
    %cst_5 = arith.constant 2.500000e-01 : f32
    %9 = vector.broadcast %cst_4 : f32 to vector<16x128xf32>
    %10 = vector.broadcast %cst_5 : f32 to vector<16x128xf32>
    %11 = arith.select %8, %9, %10 : vector<16x128xi1>, vector<16x128xf32>
    %12 = arith.mulf %6, %11 : vector<16x128xf32>
    %13 = vector.extract_strided_slice %12 {offsets = [0, 0], sizes = [8, 128], strides = [1, 1]} : vector<16x128xf32> to vector<8x128xf32>
    %14 = vector.extract_strided_slice %12 {offsets = [8, 0], sizes = [8, 128], strides = [1, 1]} : vector<16x128xf32> to vector<8x128xf32>
    %15 = arith.addf %13, %14 : vector<8x128xf32>
    %c0_6 = arith.constant 0 : index
    %c0_7 = arith.constant 0 : index
    %16 = vector.load %arg5[%c0_6, %c0_7] : memref<8x128xf32, #tpu.memory_space<vmem>>, vector<8x128xf32>
    %17 = arith.addf %16, %15 : vector<8x128xf32>
    %c0_8 = arith.constant 0 : index
    %c0_9 = arith.constant 0 : index
    %18 = vector.load %arg5[%c0_8, %c0_9] : memref<8x128xf32, #tpu.memory_space<vmem>>, vector<8x128xf32>
    tpu.vector_store %arg5[%c0_8, %c0_9], %17 {strides = array<i32>} : memref<8x128xf32, #tpu.memory_space<vmem>>, vector<8x128xf32>,
    %c0_i32_10 = arith.constant 0 : i32
    %19 = arith.cmpi eq, %arg1, %c0_i32_10 : i32
    %20 = arith.extui %19 : i1 to i32
    %c0_i32_11 = arith.constant 0 : i32
    %21 = arith.cmpi ne, %20, %c0_i32_11 : i32
    scf.if %21 {
      %c0_12 = arith.constant 0 : index
      %c0_13 = arith.constant 0 : index
      %22 = vector.load %arg5[%c0_12, %c0_13] : memref<8x128xf32, #tpu.memory_space<vmem>>, vector<8x128xf32>
      %c0_14 = arith.constant 0 : index
      %c0_15 = arith.constant 0 : index
      %23 = vector.load %arg4[%c0_14, %c0_15] : memref<8x128xf32, #tpu.memory_space<vmem>>, vector<8x128xf32>
      tpu.vector_store %arg4[%c0_14, %c0_15], %22 {strides = array<i32>} : memref<8x128xf32, #tpu.memory_space<vmem>>, vector<8x128xf32>,
    } else {
    }
    return
  }
  func.func @transform_0(%arg0: i32, %arg1: i32) -> (i32, i32) {
    %c0_i32 = arith.constant 0 : i32
    return %arg0, %arg1 : i32, i32
  }
  func.func @transform_1(%arg0: i32, %arg1: i32) -> (i32, i32) {
    %c0_i32 = arith.constant 0 : i32
    return %arg0, %arg1 : i32, i32
  }
  func.func @transform_2(%arg0: i32, %arg1: i32) -> (i32, i32) {
    %c0_i32 = arith.constant 0 : i32
    %c0_i32_0 = arith.constant 0 : i32
    return %arg0, %c0_i32 : i32, i32
  }
}

</mosaic_0001>

<bundles_post_ra>
// kernel: tpu_custom_call.1
= control target key start
LH: loop header
LB: loop body
LE: loop exit
PB: predicated region body
PF: predicated region fallthrough
CT: control target
= control target key end

     0   :  { %7 = vsyncpa [#allocation4], 0  ;;  %s219_s0 = inlined_call_operand.hbm [shape: f32[16,128], index: 0, kind: input, shape index: {}]   ;;  %s220_s1 = inlined_call_operand.hbm [shape: f32[16,128], index: 1, kind: input, shape index: {}]   ;;  %s221_s2 = inlined_call_operand.hbm [shape: f32[8,128], index: 2, kind: output, shape index: {}]  }
   0x1   :  { %8 = vsyncpa [#allocation7], 0 }
   0x2   :  { %9 = vsyncpa [#allocation5], 0  ;;  %s162_s9 = smov [#allocation3]   ;;  %s90_s13 = scalar_lea.hbm %s219_s0, 256 }
   0x3   :  { %s15_s10 = sshll.u32 %s162_s9, 4  ;;  %p91_p0 = scmp.ne.s32.totalorder %s219_s0, %s90_s13  ;;  %s16_s10 = int_to_ptr.vmem [resolvable:$true] %s15_s10 }
   0x4   :  { %p94_p1 = scmp.lt.u32.totalorder %s90_s13, %s219_s0 }
   0x6   :  { %p96_p2 = pnand %p94_p1, %p91_p0 }
   0x8   :  { %99 = shalt.err (!%p96_p2)
}
   0x9   :  { %s100_s18 = scalar_lea.vmem %s16_s10, 256  ;;  %p105_p4 = scmp.lt.s32.totalorder %s16_s10, %s16_s10 }
   0xa   :  { %p101_p3 = scmp.ne.s32.totalorder %s16_s10, %s100_s18  ;;  %p106_p5 = scmp.lt.s32.totalorder %s100_s18, %s100_s18 }
   0xc   :  { %p107_p6 = por %p106_p5, %p105_p4 }
   0xe   :  { %p108_p7 = pnand %p107_p6, %p101_p3 }
  0x10   :  { %111 = shalt.err (!%p108_p7)
}
  0x11   :  { %s163_s19 = smov 128   ;;  %s164_s20 = smov 8  }
  0x12   :  { %21 = dma.hbm_to_vmem [thread:$0]  %s219_s0, 256, %s16_s10, [#allocation4], %s163_s19, %s163_s19, %s164_s20  }
  0x13   :  { %s165_s23 = smov [#allocation6]   ;;  %s112_s27 = scalar_lea.hbm %s220_s1, 256 }
  0x14   :  { %s27_s24 = sshll.u32 %s165_s23, 4  ;;  %p113_p8 = scmp.ne.s32.totalorder %s220_s1, %s112_s27  ;;  %s28_s24 = int_to_ptr.vmem [resolvable:$true] %s27_s24 }
  0x15   :  { %p116_p9 = scmp.lt.u32.totalorder %s112_s27, %s220_s1 }
  0x17   :  { %p118_p10 = pnand %p116_p9, %p113_p8 }
  0x19   :  { %121 = shalt.err (!%p118_p10)
}
  0x1a   :  { %s122_s4 = scalar_lea.vmem %s28_s24, 256  ;;  %p127_p12 = scmp.lt.s32.totalorder %s28_s24, %s28_s24 }
  0x1b   :  { %p123_p11 = scmp.ne.s32.totalorder %s28_s24, %s122_s4  ;;  %p128_p13 = scmp.lt.s32.totalorder %s122_s4, %s122_s4 }
  0x1d   :  { %p129_p0 = por %p128_p13, %p127_p12 }
  0x1f   :  { %p130_p1 = pnand %p129_p0, %p123_p11 }
  0x21   :  { %133 = shalt.err (!%p130_p1)
}
  0x22   :  { %33 = dma.hbm_to_vmem [thread:$0]  %s220_s1, 256, %s28_s24, [#allocation7], %s163_s19, %s163_s19, %s164_s20  }
  0x23   :  { %156 = dma.done.wait [#allocation4], 256  }
  0x24   :  { %157 = vsyncadd [#allocation4], 4294967040 }
  0x25   :  { %158 = dma.done.wait [#allocation7], 256  }
  0x26   :  { %159 = vsyncadd [#allocation7], 4294967040  ;;  %v45_v0 = vld [vmem:[#allocation3] sm:$0xff]  ;;  %v46_v1 = vld [vmem:[#allocation3 + $0x8] sm:$0xff]  ;;  %v166_v8 = vmov 0.25   ;;  %s167_s6 = smov [#allocation8]  }
  0x27   :  { %v47_v2 = vld [vmem:[#allocation6] sm:$0xff]  ;;  %v48_v3 = vld [vmem:[#allocation6 + $0x8] sm:$0xff]  ;;  %s74_s1 = sshll.u32 %s167_s6, 4  ;;  %s75_s1 = int_to_ptr.vmem [resolvable:$true] %s74_s1 }
  0x28   :  { %v49_v4 = vsub.f32 %v45_v0, %v47_v2  ;;  %v50_v5 = vsub.f32 %v46_v1, %v48_v3  ;;  %s134_s7 = scalar_lea.vmem %s75_s1, 128  ;;  %p139_p3 = scmp.lt.s32.totalorder %s75_s1, %s75_s1 }
  0x29   :  { %p135_p2 = scmp.ne.s32.totalorder %s75_s1, %s134_s7  ;;  %p140_p4 = scmp.lt.s32.totalorder %s134_s7, %s134_s7 }
  0x2a   :  { %v51_v6 = vmul.f32 %v49_v4, %v49_v4  ;;  %vm53_vm0 = vcmp.gt.f32.partialorder %v49_v4, 0.0  ;;  %v52_v7 = vmul.f32 %v50_v5, %v50_v5  ;;  %vm54_vm1 = vcmp.gt.f32.partialorder %v50_v5, 0.0 }
  0x2b   :  { %v55_v9 = vsel %vm53_vm0, 4.0, %v166_v8  ;;  %v56_v10 = vsel %vm54_vm1, 4.0, %v166_v8  ;;  %p141_p5 = por %p140_p4, %p139_p3 }
  0x2c   :  { %v57_v11 = vmul.f32 %v55_v9, %v51_v6  ;;  %v58_v12 = vmul.f32 %v56_v10, %v52_v7 }
  0x2d   :  { %p142_p6 = pnand %p141_p5, %p135_p2 }
  0x2e   :  { %v59_v13 = vadd.f32 %v58_v12, %v57_v11 }
  0x30   :  { %67 = vst [vmem:[#allocation8] sm:$0xff] %v59_v13 }
  0x31   :  { %145 = shalt.err (!%p142_p6)
}
  0x32   :  { %s146_s10 = scalar_lea.hbm %s221_s2, 128 }
  0x33   :  { %p147_p7 = scmp.ne.s32.totalorder %s221_s2, %s146_s10  ;;  %p150_p8 = scmp.lt.u32.totalorder %s146_s10, %s221_s2 }
  0x35   :  { %p152_p9 = pnand %p150_p8, %p147_p7 }
  0x37   :  { %155 = shalt.err (!%p152_p9)
}
  0x38   :  { %77 = dma.vmem_to_hbm [thread:$0]  %s75_s1, 128, %s221_s2, [#allocation5]  }
  0x39   :  { %160 = dma.done.wait [#allocation5], 128  }
  0x3a   :  { %161 = vsyncadd [#allocation5], 4294967168 }
  0x3b   :  { %81 = vsyncpa [#allocation4], 1 }
  0x3c   :  { %82 = vsyncpa [#allocation7], 1 }
  0x3d   :  { %83 = vsyncpa [#allocation5], 1 }

</bundles_post_ra>
